<compile_context>
chip_gen: v6e
topology: v6e:2x2x1
jax: 0.10.0
libtpu: 0.0.40
codegen_flags: <defaults>
</compile_context>

<pallas_src>
import math

import jax
import jax.numpy as jnp
from jax.experimental import pallas as pl
from jax.experimental.pallas import tpu as pltpu

# ----------------------------- configuration --------------------------------
DMODEL = 32
N_HIDDEN = 32
N_CLASSES = 8
BATCH = 2

LANE = 128   # lane-dense output width
TB = 8       # batch (row) tile: multiple of the f32 sublane count


# ----------------------------- Pallas kernel --------------------------------
def head_kernel(x_ref, w1_ref, b1_ref, w2_ref, b2_ref, o_ref):
    """Fused Linear -> ReLU -> Linear on one row tile; weights VMEM-resident."""
    # MXU does the widening; accumulate in f32.
    h = jnp.dot(x_ref[...], w1_ref[...], preferred_element_type=jnp.float32)
    h = jnp.maximum(h + b1_ref[...], 0.0)                 # bias + ReLU in f32
    out = jnp.dot(h, w2_ref[...], preferred_element_type=jnp.float32)
    out = out + b2_ref[...]                               # (TB, LANE) lane-dense
    o_ref[...] = out.astype(o_ref.dtype)


# ----------------------------- wrapper ---------------------------------------
def classification_head(x, w1, b1, w2, b2, *, block_b=TB):
    """x: (B, dmodel); w1: (dmodel, n_hidden); b1: (n_hidden,);
    w2: (n_hidden, n_classes); b2: (n_classes,).  Returns (B, n_classes)."""
    B, D = x.shape
    NH = w1.shape[1]
    NC = w2.shape[1]
    out_dtype = x.dtype

    # Lane-dense class dim: zero-pad w2 / b2 columns up to a multiple of 128.
    ncp = pl.cdiv(NC, LANE) * LANE
    w2p = jnp.pad(w2, ((0, 0), (0, ncp - NC)))
    b2p = jnp.pad(b2.reshape(1, NC), ((0, 0), (0, ncp - NC))).astype(jnp.float32)
    b1f = b1.reshape(1, NH).astype(jnp.float32)

    # Pad the batch to a multiple of the row tile; extra rows are sliced off.
    bp = pl.cdiv(B, block_b) * block_b
    xp = jnp.pad(x, ((0, bp - B), (0, 0)))

    flops = 2 * B * (D * NH + NH * NC)
    bytes_accessed = (
        x.size * x.dtype.itemsize
        + w1.size * w1.dtype.itemsize + NH * 4
        + w2.size * w2.dtype.itemsize + NC * 4
        + B * NC * jnp.dtype(out_dtype).itemsize
    )

    out = pl.pallas_call(
        head_kernel,
        out_shape=jax.ShapeDtypeStruct((bp, ncp), out_dtype),
        grid_spec=pltpu.PrefetchScalarGridSpec(
            num_scalar_prefetch=0,
            grid=(bp // block_b,),
            in_specs=[
                pl.BlockSpec((block_b, D), lambda i: (i, 0)),  # x row tiles
                pl.BlockSpec((D, NH),      lambda i: (0, 0)),  # resident weights
                pl.BlockSpec((1, NH),      lambda i: (0, 0)),
                pl.BlockSpec((NH, ncp),    lambda i: (0, 0)),
                pl.BlockSpec((1, ncp),     lambda i: (0, 0)),
            ],
            out_specs=pl.BlockSpec((block_b, ncp), lambda i: (i, 0)),
        ),
        compiler_params=pltpu.CompilerParams(
            dimension_semantics=("parallel",)),
        cost_estimate=pl.CostEstimate(
            flops=flops, transcendentals=0, bytes_accessed=bytes_accessed),
    )(xp, w1, b1f, w2p, b2p)

    return out[:B, :NC]


# ----------------------------- main ------------------------------------------
if __name__ == "__main__":
    key = jax.random.PRNGKey(0)
    kx, kw1, kb1, kw2, kb2 = jax.random.split(key, 5)

    x = jax.random.normal(kx, (BATCH, DMODEL), jnp.float32)

    # nn.Linear-style init: U(-1/sqrt(fan_in), 1/sqrt(fan_in)); weights (in, out).
    lim1 = 1.0 / math.sqrt(DMODEL)
    w1 = jax.random.uniform(kw1, (DMODEL, N_HIDDEN), jnp.float32, -lim1, lim1)
    b1 = jax.random.uniform(kb1, (N_HIDDEN,), jnp.float32, -lim1, lim1)
    lim2 = 1.0 / math.sqrt(N_HIDDEN)
    w2 = jax.random.uniform(kw2, (N_HIDDEN, N_CLASSES), jnp.float32, -lim2, lim2)
    b2 = jax.random.uniform(kb2, (N_CLASSES,), jnp.float32, -lim2, lim2)

    out = jax.jit(classification_head)(x, w1, b1, w2, b2)
    out = jax.block_until_ready(out)

    # Pure-JAX reference: linear2(relu(linear1(x)))
    ref = jnp.maximum(x @ w1 + b1[None, :], 0.0) @ w2 + b2[None, :]

    assert out.shape == (BATCH, N_CLASSES), out.shape
    assert out.dtype == x.dtype, out.dtype
    assert bool(jnp.all(jnp.isfinite(out)))
    assert bool(jnp.allclose(out, ref, atol=1e-5, rtol=1e-5)), "mismatch vs reference"
    print("KERNEL_OK")
</pallas_src>

<mosaic_0001>
module attributes {stable_mosaic.version = 11 : i64} {
  func.func @head_kernel(%arg0: i32, %arg1: memref<8x32xf32, #tpu.memory_space<vmem>>, %arg2: memref<32x32xf32, #tpu.memory_space<vmem>>, %arg3: memref<1x32xf32, #tpu.memory_space<vmem>>, %arg4: memref<32x128xf32, #tpu.memory_space<vmem>>, %arg5: memref<1x128xf32, #tpu.memory_space<vmem>>, %arg6: memref<8x128xf32, #tpu.memory_space<vmem>>) attributes {dimension_semantics = [#tpu.dimension_semantics<parallel>], iteration_bounds = array<i64: 1>, scalar_prefetch = 0 : i64, scratch_operands = 0 : i64, tpu.core_type = #tpu.core_type<tc>, window_params = [{transform_indices = @transform_0, window_bounds = array<i64: 8, 32>}, {pipeline_mode = #tpu.pipeline_mode<synchronous>, transform_indices = @transform_1, window_bounds = array<i64: 32, 32>}, {pipeline_mode = #tpu.pipeline_mode<synchronous>, transform_indices = @transform_2, window_bounds = array<i64: 1, 32>}, {pipeline_mode = #tpu.pipeline_mode<synchronous>, transform_indices = @transform_3, window_bounds = array<i64: 32, 128>}, {pipeline_mode = #tpu.pipeline_mode<synchronous>, transform_indices = @transform_4, window_bounds = array<i64: 1, 128>}, {transform_indices = @transform_5, window_bounds = array<i64: 8, 128>}]} {
    %c0 = arith.constant 0 : index
    %c0_0 = arith.constant 0 : index
    %0 = vector.load %arg1[%c0, %c0_0] : memref<8x32xf32, #tpu.memory_space<vmem>>, vector<8x32xf32>
    %c0_1 = arith.constant 0 : index
    %c0_2 = arith.constant 0 : index
    %1 = vector.load %arg2[%c0_1, %c0_2] : memref<32x32xf32, #tpu.memory_space<vmem>>, vector<32x32xf32>
    %cst = arith.constant dense<0.000000e+00> : vector<8x32xf32>
    %2 = tpu.matmul %0, %1, %cst {dimension_numbers = #tpu.dot_dimension_numbers<[1], [0], [0], [1], [0, 0, 1, 1], [], []>} : vector<8x32xf32>, vector<32x32xf32>, vector<8x32xf32> -> vector<8x32xf32>
    %c0_3 = arith.constant 0 : index
    %c0_4 = arith.constant 0 : index
    %3 = vector.load %arg3[%c0_3, %c0_4] : memref<1x32xf32, #tpu.memory_space<vmem>>, vector<1x32xf32>
    %4 = vector.broadcast %3 : vector<1x32xf32> to vector<8x32xf32>
    %5 = arith.addf %2, %4 : vector<8x32xf32>
    %cst_5 = arith.constant 0.000000e+00 : f32
    %6 = vector.broadcast %cst_5 : f32 to vector<8x32xf32>
    %7 = arith.maximumf %5, %6 : vector<8x32xf32>
    %c0_6 = arith.constant 0 : index
    %c0_7 = arith.constant 0 : index
    %8 = vector.load %arg4[%c0_6, %c0_7] : memref<32x128xf32, #tpu.memory_space<vmem>>, vector<32x128xf32>
    %cst_8 = arith.constant dense<0.000000e+00> : vector<8x128xf32>
    %9 = tpu.matmul %7, %8, %cst_8 {dimension_numbers = #tpu.dot_dimension_numbers<[1], [0], [0], [1], [0, 0, 1, 1], [], []>} : vector<8x32xf32>, vector<32x128xf32>, vector<8x128xf32> -> vector<8x128xf32>
    %c0_9 = arith.constant 0 : index
    %c0_10 = arith.constant 0 : index
    %10 = vector.load %arg5[%c0_9, %c0_10] : memref<1x128xf32, #tpu.memory_space<vmem>>, vector<1x128xf32>
    %11 = vector.broadcast %10 : vector<1x128xf32> to vector<8x128xf32>
    %12 = arith.addf %9, %11 : vector<8x128xf32>
    %c0_11 = arith.constant 0 : index
    %c0_12 = arith.constant 0 : index
    %13 = vector.load %arg6[%c0_11, %c0_12] : memref<8x128xf32, #tpu.memory_space<vmem>>, vector<8x128xf32>
    tpu.vector_store %arg6[%c0_11, %c0_12], %12 {strides = array<i32>} : memref<8x128xf32, #tpu.memory_space<vmem>>, vector<8x128xf32>,
    return
  }
  func.func @transform_0(%arg0: i32) -> (i32, i32) {
    %c0_i32 = arith.constant 0 : i32
    %c0_i32_0 = arith.constant 0 : i32
    return %arg0, %c0_i32 : i32, i32
  }
  func.func @transform_1(%arg0: i32) -> (i32, i32) {
    %c0_i32 = arith.constant 0 : i32
    %c0_i32_0 = arith.constant 0 : i32
    %c0_i32_1 = arith.constant 0 : i32
    return %c0_i32, %c0_i32_0 : i32, i32
  }
  func.func @transform_2(%arg0: i32) -> (i32, i32) {
    %c0_i32 = arith.constant 0 : i32
    %c0_i32_0 = arith.constant 0 : i32
    %c0_i32_1 = arith.constant 0 : i32
    return %c0_i32, %c0_i32_0 : i32, i32
  }
  func.func @transform_3(%arg0: i32) -> (i32, i32) {
    %c0_i32 = arith.constant 0 : i32
    %c0_i32_0 = arith.constant 0 : i32
    %c0_i32_1 = arith.constant 0 : i32
    return %c0_i32, %c0_i32_0 : i32, i32
  }
  func.func @transform_4(%arg0: i32) -> (i32, i32) {
    %c0_i32 = arith.constant 0 : i32
    %c0_i32_0 = arith.constant 0 : i32
    %c0_i32_1 = arith.constant 0 : i32
    return %c0_i32, %c0_i32_0 : i32, i32
  }
  func.func @transform_5(%arg0: i32) -> (i32, i32) {
    %c0_i32 = arith.constant 0 : i32
    %c0_i32_0 = arith.constant 0 : i32
    return %arg0, %c0_i32 : i32, i32
  }
}

</mosaic_0001>

<bundles_post_ra>
// kernel: classification_head.1
= control target key start
LH: loop header
LB: loop body
LE: loop exit
PB: predicated region body
PF: predicated region fallthrough
CT: control target
= control target key end

     0   :  { %v234_v0 = vmov 0.0   ;;  %vm235_vm0 = vmmov 0   ;;  %vm32_vm1 = vcmask 261120   ;;  %s304_s1 = inlined_call_operand.vmem [shape: f32[32,32], index: 1, kind: input, shape index: {}]   ;;  %s305_s3 = inlined_call_operand.vmem [shape: f32[32,128], index: 3, kind: input, shape index: {}]   ;;  %s306_s0 = inlined_call_operand.vmem [shape: f32[8,32], index: 0, kind: input, shape index: {}]   ;;  %s307_s2 = inlined_call_operand.vmem [shape: f32[1,32], index: 2, kind: input, shape index: {}]   ;;  %s308_s4 = inlined_call_operand.vmem [shape: f32[1,128], index: 4, kind: input, shape index: {}]   ;;  %s309_s5 = inlined_call_operand.vmem [shape: f32[8,128], index: 5, kind: output, shape index: {}]  }
   0x1   :  { %210 = vmatprep.subr.mxu0 %v234_v0  ;;  %v24_v1 = vld [vmem:[%s304_s1 + $0x18] sm:$0xff]  ;;  %v23_v2 = vld [vmem:[%s304_s1 + $0x10] sm:$0xff]  ;;  %218 = vmatprep.mubr.msk.f32.mxu0 %vm235_vm0, %v234_v0  ;;  %v22_v4 = vld [vmem:[%s304_s1 + $0x8] sm:$0xff] }
   0x2   :  { %211 = vmatpush3.msra.mxu0 %v24_v1  ;;  %221 = vmatprep.subr.mxu1 %v234_v0  ;;  %v110_v3 = vld [vmem:[%s305_s3 + $0x18] sm:$0xff]  ;;  %v21_v5 = vld [vmem:[%s304_s1] sm:$0xff]  ;;  %v109_v7 = vld [vmem:[%s305_s3 + $0x10] sm:$0xff] }
   0x3   :  { %212 = vmatprep.subr.mxu0 %v234_v0  ;;  %222 = vmatpush3.msra.mxu1 %v110_v3  ;;  %v20_v6 = vld [vmem:[%s306_s0] sm:$0xff]  ;;  %v108_v8 = vld [vmem:[%s305_s3 + $0x8] sm:$0xff] }
   0x4   :  { %213 = vmatpush3.msra.mxu0 %v23_v2  ;;  %223 = vmatprep.subr.mxu1 %v234_v0  ;;  %v107_v9 = vld [vmem:[%s305_s3] sm:$0xff] }
   0x5   :  { %214 = vmatprep.subr.mxu0 %v234_v0  ;;  %229 = vmatprep.mubr.msk.f32.mxu1 %vm235_vm0, %v234_v0  ;;  %v196_v10 = vld [vmem:[%s307_s2] ss:$0 sm:$0xff] }
   0x6   :  { %215 = vmatpush3.msra.mxu0 %v22_v4  ;;  %224 = vmatpush3.msra.mxu1 %v109_v7  ;;  %v198_v15 = vld [vmem:[%s308_s4] ss:$0 sm:$0xff] }
   0x7   :  { %216 = vmatprep.subr.mxu0 %v234_v0  ;;  %225 = vmatprep.subr.mxu1 %v234_v0 }
   0x8   :  { %217 = vmatpush3.msra.mxu0 %v21_v5  ;;  %226 = vmatpush3.msra.mxu1 %v108_v8 }
   0x9   :  { %219 = vmatmul.mubr.msk.f32.vlgmr.msra.gmra.mxu0 %vm32_vm1, %v20_v6  ;;  %227 = vmatprep.subr.mxu1 %v234_v0 }
   0xa   :  { %228 = vmatpush3.msra.mxu1 %v107_v9 }
  0xc9   :  { %v102_v11 = vpop.f32.mrf.mxu0 }
  0xca   :  { %v103_v12 = vadd.f32 %v196_v10, %v102_v11 }
  0xcb   :  { %v220_v13 = vpop.f32.mrf.mxu0 }
  0xcc   :  { %v106_v14 = vmax.f32 %v103_v12, 0.0 }
  0xce   :  { %230 = vmatmul.mubr.msk.f32.vlgmr.msra.gmra.mxu1 %vm32_vm1, %v106_v14 }
 0x18e   :  { %v187_v16 = vpop.f32.mrf.mxu1 }
 0x18f   :  { %v188_v17 = vadd.f32 %v198_v15, %v187_v16 }
 0x190   :  { %v231_v18 = vpop.f32.mrf.mxu1 }
 0x191   :  { %191 = vst [vmem:[%s309_s5] sm:$0xff] %v188_v17 }

</bundles_post_ra>
